<compile_context>
chip_gen: v6e
topology: v6e:2x2x1
jax: 0.10.0
libtpu: 0.0.40
codegen_flags: <defaults>
</compile_context>

<pallas_src>
import math

import jax
import jax.numpy as jnp
from jax import lax
from jax.experimental import pallas as pl
from jax.experimental.pallas import tpu as pltpu


# ----------------------------------------------------------------------------
# Tiled linear kernel: y = x @ wT, with wT = W.T stored (K, Nout) at init.
# ----------------------------------------------------------------------------
def _linear_kernel(x_ref, w_ref, o_ref, acc_ref):
    """One (tm, tn) output tile; accumulate over the K grid axis in f32 VMEM."""
    @pl.when(pl.program_id(2) == 0)
    def _init():
        acc_ref[...] = jnp.zeros_like(acc_ref)

    # Fuse the activation cast into the kernel (no separate HBM cast pass).
    x = x_ref[...].astype(jnp.bfloat16)
    acc_ref[...] += jnp.dot(x, w_ref[...], preferred_element_type=jnp.float32)

    @pl.when(pl.program_id(2) == pl.num_programs(2) - 1)
    def _store():
        o_ref[...] = acc_ref[...].astype(o_ref.dtype)


def _pick_tile(dim, candidates):
    """Largest MXU-friendly divisor of `dim`, else the full dim (small shapes)."""
    for c in candidates:
        if dim % c == 0:
            return c
    return dim


def pallas_linear(x2d, wT, out_dtype=jnp.float32):
    """x2d: (M, K); wT: (K, Nout) bf16 (pre-transposed nn.Linear weight)."""
    M, K = x2d.shape
    K2, Nout = wT.shape
    assert K == K2

    tm = _pick_tile(M, (512, 256, 128))
    tn = _pick_tile(Nout, (512, 256, 128))
    tk = _pick_tile(K, (1024, 512, 256, 128))
    grid = (M // tm, Nout // tn, K // tk)

    cost = pl.CostEstimate(
        flops=int(2 * M * Nout * K),
        transcendentals=0,
        bytes_accessed=int(
            M * K * x2d.dtype.itemsize
            + K * Nout * wT.dtype.itemsize
            + M * Nout * jnp.dtype(out_dtype).itemsize
        ),
    )

    return pl.pallas_call(
        _linear_kernel,
        out_shape=jax.ShapeDtypeStruct((M, Nout), out_dtype),
        grid_spec=pltpu.PrefetchScalarGridSpec(
            num_scalar_prefetch=0,
            grid=grid,
            in_specs=[
                pl.BlockSpec((tm, tk), lambda i, j, k: (i, k)),
                pl.BlockSpec((tk, tn), lambda i, j, k: (k, j)),
            ],
            out_specs=pl.BlockSpec((tm, tn), lambda i, j, k: (i, j)),
            scratch_shapes=[pltpu.VMEM((tm, tn), jnp.float32)],
        ),
        compiler_params=pltpu.CompilerParams(
            dimension_semantics=("parallel", "parallel", "arbitrary"),
            vmem_limit_bytes=48 * 1024 * 1024,
        ),
        cost_estimate=cost,
    )(x2d, wT)


# ----------------------------------------------------------------------------
# Multi-head attention kernel: one (batch, q-tile) per grid step; heads are
# lane slices of a (.., E) block; output accumulated into a (tq, E) VMEM slab.
# ----------------------------------------------------------------------------
def _make_mha_kernel(num_heads, head_dim, has_bias, bias_per_head, with_weights):
    H, D = num_heads, head_dim

    def kernel(*refs):
        idx = 0
        q_ref = refs[idx]; idx += 1          # (tq, E) bf16, Q pre-scaled by 1/sqrt(D)
        k_ref = refs[idx]; idx += 1          # (S,  E) bf16
        v_ref = refs[idx]; idx += 1          # (S,  E) bf16
        b_ref = None
        if has_bias:
            b_ref = refs[idx]; idx += 1      # (Hb, tq, S) bf16 additive bias
        o_ref = refs[idx]; idx += 1          # (tq, E) bf16
        w_ref = None
        if with_weights:
            w_ref = refs[idx]; idx += 1      # (H, tq, S) f32
        acc_ref = refs[idx]                  # (tq, E) f32 VMEM scratch

        shared_bias = None
        if has_bias and not bias_per_head:
            shared_bias = b_ref[0]           # (tq, S)

        for h in range(H):
            lo = h * D
            q_h = q_ref[:, pl.ds(lo, D)]     # (tq, D)
            k_h = k_ref[:, pl.ds(lo, D)]     # (S,  D)
            v_h = v_ref[:, pl.ds(lo, D)]     # (S,  D)

            # (pre-scaled q) @ k.T on the MXU with f32 accumulation.
            logits = lax.dot_general(
                q_h, k_h,
                dimension_numbers=(((1,), (1,)), ((), ())),
                preferred_element_type=jnp.float32,
            )                                 # (tq, S) f32

            if has_bias:
                logits = logits + (b_ref[h] if bias_per_head else shared_bias)

            # Numerically-stable softmax pieces in f32.
            row_max = jnp.max(logits, axis=-1, keepdims=True)
            p = jnp.exp(logits - row_max)                     # (tq, S)
            denom = jnp.sum(p, axis=-1, keepdims=True)        # (tq, 1)

            if with_weights:
                # Exact normalization so returned weights sum to 1.
                attn = p / denom
                w_ref[h] = attn.astype(w_ref.dtype)
                out_h = jnp.dot(attn.astype(v_h.dtype), v_h,
                                preferred_element_type=jnp.float32)
            else:
                # Deferred normalization: scale the (tq, D) PV result instead
                # of the (tq, S) probabilities; approx reciprocal -> EUP slot.
                out_h = jnp.dot(p.astype(v_h.dtype), v_h,
                                preferred_element_type=jnp.float32)
                out_h = out_h * pl.reciprocal(denom, approx=True)

            acc_ref[:, pl.ds(lo, D)] = out_h

        # Single lane-dense store in (N, S, E) layout.
        o_ref[...] = acc_ref[...].astype(o_ref.dtype)

    return kernel


def _pick_q_tile(S):
    # Cap at 256 so larger S still yields >=2 q-steps (v7x megacore, pipelining).
    if S <= 256:
        return S
    for t in (256, 128):
        if S % t == 0:
            return t
    return S


def pallas_mha(qkv4, bias4, num_heads, head_dim, return_attention):
    """qkv4: (N, S, 3, E) bf16 with lane-dim E = H*D (Q pre-scaled).
    bias4: None or (Nb, Hb, S, S) bf16 additive bias (0 attend / -1e30 excluded),
    Nb in {1, N}, Hb in {1, H}. Returns (N, S, E) bf16 values and optionally
    (N, H, S, S) f32 attention weights."""
    N, S, three, E = qkv4.shape
    assert three == 3 and E == num_heads * head_dim

    tq = _pick_q_tile(S)
    grid = (N, S // tq)

    # Q/K/V selected from the same (N, S, 3, E) array purely via index maps.
    q_spec = pl.BlockSpec((None, tq, None, E), lambda b, qi: (b, qi, 0, 0))
    k_spec = pl.BlockSpec((None, S, None, E), lambda b, qi: (b, 0, 1, 0))
    v_spec = pl.BlockSpec((None, S, None, E), lambda b, qi: (b, 0, 2, 0))
    in_specs = [q_spec, k_spec, v_spec]
    inputs = [qkv4, qkv4, qkv4]

    has_bias = bias4 is not None
    bias_per_head = False
    if has_bias:
        Nb, Hb = bias4.shape[0], bias4.shape[1]
        assert bias4.shape[2:] == (S, S)
        bias_per_head = Hb != 1
        if Nb == 1:
            b_index = lambda b, qi: (0, 0, qi, 0)
        else:
            b_index = lambda b, qi: (b, 0, qi, 0)
        in_specs.append(pl.BlockSpec((None, Hb, tq, S), b_index))
        inputs.append(bias4)

    out_shape = [jax.ShapeDtypeStruct((N, S, E), jnp.bfloat16)]
    out_specs = [pl.BlockSpec((None, tq, E), lambda b, qi: (b, qi, 0))]
    if return_attention:
        out_shape.append(jax.ShapeDtypeStruct((N, num_heads, S, S), jnp.float32))
        out_specs.append(
            pl.BlockSpec((None, num_heads, tq, S), lambda b, qi: (b, 0, qi, 0)))

    kernel = _make_mha_kernel(num_heads, head_dim, has_bias, bias_per_head,
                              return_attention)

    cost = pl.CostEstimate(
        flops=int(4 * N * num_heads * S * S * head_dim),
        transcendentals=int(N * num_heads * S * S),
        bytes_accessed=int(
            qkv4.size * qkv4.dtype.itemsize
            + (bias4.size * bias4.dtype.itemsize if has_bias else 0)
            + N * S * E * 2
            + (N * num_heads * S * S * 4 if return_attention else 0)
        ),
    )

    results = pl.pallas_call(
        kernel,
        out_shape=tuple(out_shape),
        grid_spec=pltpu.PrefetchScalarGridSpec(
            num_scalar_prefetch=0,
            grid=grid,
            in_specs=in_specs,
            out_specs=tuple(out_specs),
            scratch_shapes=[pltpu.VMEM((tq, E), jnp.float32)],
        ),
        compiler_params=pltpu.CompilerParams(
            dimension_semantics=("parallel", "parallel"),
            vmem_limit_bytes=48 * 1024 * 1024,
        ),
        cost_estimate=cost,
    )(*inputs)

    if return_attention:
        values, weights = results
        return values, weights
    (values,) = results
    return values, None


# ----------------------------------------------------------------------------
# Module wrapper
# ----------------------------------------------------------------------------
def xavier_uniform(key, shape):
    """Matches torch.nn.init.xavier_uniform_ for a 2D (out, in) weight."""
    fan_out, fan_in = shape
    bound = math.sqrt(6.0 / (fan_in + fan_out))
    return jax.random.uniform(key, shape, jnp.float32, minval=-bound, maxval=bound)


class MultiHeadAttentionPallas:
    def __init__(self, embed_dim, num_heads, key):
        assert embed_dim % num_heads == 0
        self.embed_dim = embed_dim
        self.num_heads = num_heads
        self.head_dim = embed_dim // num_heads
        k1, k2 = jax.random.split(key)
        # PyTorch nn.Linear weights are (out_features, in_features); keep f32
        # originals for the reference, plus kernel-ready copies below.
        self.qkv_w = xavier_uniform(k1, (3 * embed_dim, embed_dim))
        self.o_w = xavier_uniform(k2, (embed_dim, embed_dim))
        # use_bias=False -> no bias terms

        # One-time: fold 1/sqrt(D) into the Q rows, transpose to (in, out),
        # cast to bf16. Done once at init, not per call.
        scale = 1.0 / math.sqrt(self.head_dim)
        qkv_w_scaled = self.qkv_w.at[:embed_dim, :].multiply(scale)
        self.qkv_wT_bf = jnp.transpose(qkv_w_scaled).astype(jnp.bfloat16)   # (E, 3E)
        self.o_wT_bf = jnp.transpose(self.o_w).astype(jnp.bfloat16)         # (E, E)

    def __call__(self, x, attn_mask=None, return_attention=False):
        N, S, E = x.shape
        H, D = self.num_heads, self.head_dim
        assert E == self.embed_dim

        # --- QKV projection (tiled Pallas matmul; x cast fused in-kernel).
        # Output kept bf16, reshaped for free to (N, S, 3, E). ---
        qkv = pallas_linear(x.reshape(N * S, E), self.qkv_wT_bf,
                            out_dtype=jnp.bfloat16)           # (N*S, 3E)
        qkv4 = qkv.reshape(N, S, 3, E)

        # --- mask -> additive bias at its natural broadcast shape (bf16).
        # expand_mask semantics; masked_fill where mask == 0. Finite -1e30
        # sentinel: fully-masked rows give a uniform average instead of NaN. ---
        bias4 = None
        if attn_mask is not None:
            m = jnp.asarray(attn_mask)
            assert m.ndim >= 2, "Mask must be at least 2-dimensional"
            if m.ndim == 2:
                m = m[None, None]        # (1, 1, S, S)
            elif m.ndim == 3:
                m = m[:, None]           # (N, 1, S, S)
            bias4 = jnp.where(m == 0, -1e30, 0.0).astype(jnp.bfloat16)

        # --- scaled dot-product attention (scale already folded into Q) ---
        values, attn_weights = pallas_mha(qkv4, bias4, H, D, return_attention)

        # values is already lane-dense (N, S, E) bf16; only a free reshape
        # before the output projection.
        o = pallas_linear(values.reshape(N * S, E), self.o_wT_bf,
                          out_dtype=jnp.float32).reshape(N, S, E)

        if return_attention:
            return o, attn_weights
        return o


# ----------------------------------------------------------------------------
# Pure-JAX reference (sanity check)
# ----------------------------------------------------------------------------
def reference_forward(mha, x, attn_mask=None, return_attention=False):
    N, S, E = x.shape
    H, D = mha.num_heads, mha.head_dim
    qkv = x @ mha.qkv_w.T
    q, k, v = jnp.split(qkv, 3, axis=-1)
    q = q.reshape(N, S, H, D).transpose(0, 2, 1, 3)
    k = k.reshape(N, S, H, D).transpose(0, 2, 1, 3)
    v = v.reshape(N, S, H, D).transpose(0, 2, 1, 3)
    logits = jnp.einsum("nhsd,nhtd->nhst", q, k) / math.sqrt(D)
    if attn_mask is not None:
        m = jnp.asarray(attn_mask)
        if m.ndim == 2:
            m = m[None, None]
        elif m.ndim == 3:
            m = m[:, None]
        logits = jnp.where(m == 0, -jnp.inf, logits)
    w = jax.nn.softmax(logits, axis=-1)
    vals = jnp.einsum("nhst,nhtd->nhsd", w, v)
    vals = vals.transpose(0, 2, 1, 3).reshape(N, S, E)
    out = vals @ mha.o_w.T
    if return_attention:
        return out, w
    return out


if __name__ == "__main__":
    key = jax.random.PRNGKey(0)
    k_param, k_x = jax.random.split(key)

    N, S, E, H = 2, 8, 32, 4
    mha = MultiHeadAttentionPallas(embed_dim=E, num_heads=H, key=k_param)
    x = jax.random.normal(k_x, (N, S, E), jnp.float32)

    # causal-style mask (1 = attend, 0 = excluded), broadcast over N and heads
    mask2d = jnp.tril(jnp.ones((S, S), jnp.float32))

    out, attn_w = mha(x, attn_mask=mask2d, return_attention=True)
    out = jax.block_until_ready(out)
    attn_w = jax.block_until_ready(attn_w)

    out_nomask = jax.block_until_ready(mha(x))   # mask-free fast path

    ref_out, ref_w = reference_forward(mha, x, attn_mask=mask2d,
                                       return_attention=True)
    ref_nomask = reference_forward(mha, x)

    assert out.shape == (N, S, E)
    assert attn_w.shape == (N, H, S, S)
    # bf16 MXU inputs -> compare against the f32 reference with loose tolerance
    assert jnp.allclose(out, ref_out, atol=3e-2, rtol=3e-2), "masked output mismatch"
    assert jnp.allclose(attn_w, ref_w, atol=3e-2, rtol=3e-2), "attention weights mismatch"
    assert jnp.allclose(out_nomask, ref_nomask, atol=3e-2, rtol=3e-2), "unmasked output mismatch"

    print("KERNEL_OK")
</pallas_src>

<mosaic_0001>
module attributes {stable_mosaic.version = 11 : i64} {
  func.func @_linear_kernel(%arg0: i32, %arg1: i32, %arg2: i32, %arg3: memref<16x32xf32, #tpu.memory_space<vmem>>, %arg4: memref<32x96xbf16, #tpu.memory_space<vmem>>, %arg5: memref<16x96xbf16, #tpu.memory_space<vmem>>, %arg6: memref<16x96xf32, #tpu.memory_space<vmem>>) attributes {dimension_semantics = [#tpu.dimension_semantics<parallel>, #tpu.dimension_semantics<parallel>, #tpu.dimension_semantics<arbitrary>], iteration_bounds = array<i64: 1, 1, 1>, scalar_prefetch = 0 : i64, scratch_operands = 1 : i64, tpu.core_type = #tpu.core_type<tc>, window_params = [{transform_indices = @transform_0, window_bounds = array<i64: 16, 32>}, {transform_indices = @transform_1, window_bounds = array<i64: 32, 96>}, {transform_indices = @transform_2, window_bounds = array<i64: 16, 96>}]} {
    %c0_i32 = arith.constant 0 : i32
    %0 = arith.cmpi eq, %arg2, %c0_i32 : i32
    %1 = arith.extui %0 : i1 to i32
    %c0_i32_0 = arith.constant 0 : i32
    %2 = arith.cmpi ne, %1, %c0_i32_0 : i32
    scf.if %2 {
      %cst_10 = arith.constant 0.000000e+00 : f32
      %13 = vector.broadcast %cst_10 : f32 to vector<16x96xf32>
      %c0_11 = arith.constant 0 : index
      %c0_12 = arith.constant 0 : index
      %14 = vector.load %arg6[%c0_11, %c0_12] : memref<16x96xf32, #tpu.memory_space<vmem>>, vector<16x96xf32>
      tpu.vector_store %arg6[%c0_11, %c0_12], %13 {strides = array<i32>} : memref<16x96xf32, #tpu.memory_space<vmem>>, vector<16x96xf32>,
    } else {
    }
    %c0 = arith.constant 0 : index
    %c0_1 = arith.constant 0 : index
    %3 = vector.load %arg3[%c0, %c0_1] : memref<16x32xf32, #tpu.memory_space<vmem>>, vector<16x32xf32>
    %4 = arith.truncf %3 : vector<16x32xf32> to vector<16x32xbf16>
    %c0_2 = arith.constant 0 : index
    %c0_3 = arith.constant 0 : index
    %5 = vector.load %arg6[%c0_2, %c0_3] : memref<16x96xf32, #tpu.memory_space<vmem>>, vector<16x96xf32>
    %c0_4 = arith.constant 0 : index
    %c0_5 = arith.constant 0 : index
    %6 = vector.load %arg4[%c0_4, %c0_5] : memref<32x96xbf16, #tpu.memory_space<vmem>>, vector<32x96xbf16>
    %cst = arith.constant dense<0.000000e+00> : vector<16x96xf32>
    %7 = tpu.matmul %4, %6, %cst {dimension_numbers = #tpu.dot_dimension_numbers<[1], [0], [0], [1], [0, 0, 1, 1], [], []>} : vector<16x32xbf16>, vector<32x96xbf16>, vector<16x96xf32> -> vector<16x96xf32>
    %8 = arith.addf %5, %7 : vector<16x96xf32>
    %c0_6 = arith.constant 0 : index
    %c0_7 = arith.constant 0 : index
    %9 = vector.load %arg6[%c0_6, %c0_7] : memref<16x96xf32, #tpu.memory_space<vmem>>, vector<16x96xf32>
    tpu.vector_store %arg6[%c0_6, %c0_7], %8 {strides = array<i32>} : memref<16x96xf32, #tpu.memory_space<vmem>>, vector<16x96xf32>,
    %c0_i32_8 = arith.constant 0 : i32
    %10 = arith.cmpi eq, %arg2, %c0_i32_8 : i32
    %11 = arith.extui %10 : i1 to i32
    %c0_i32_9 = arith.constant 0 : i32
    %12 = arith.cmpi ne, %11, %c0_i32_9 : i32
    scf.if %12 {
      %c0_10 = arith.constant 0 : index
      %c0_11 = arith.constant 0 : index
      %13 = vector.load %arg6[%c0_10, %c0_11] : memref<16x96xf32, #tpu.memory_space<vmem>>, vector<16x96xf32>
      %14 = arith.truncf %13 : vector<16x96xf32> to vector<16x96xbf16>
      %c0_12 = arith.constant 0 : index
      %c0_13 = arith.constant 0 : index
      %15 = vector.load %arg5[%c0_12, %c0_13] : memref<16x96xbf16, #tpu.memory_space<vmem>>, vector<16x96xbf16>
      tpu.vector_store %arg5[%c0_12, %c0_13], %14 {strides = array<i32>} : memref<16x96xbf16, #tpu.memory_space<vmem>>, vector<16x96xbf16>,
    } else {
    }
    return
  }
  func.func @transform_0(%arg0: i32, %arg1: i32, %arg2: i32) -> (i32, i32) {
    %c0_i32 = arith.constant 0 : i32
    return %arg0, %arg2 : i32, i32
  }
  func.func @transform_1(%arg0: i32, %arg1: i32, %arg2: i32) -> (i32, i32) {
    %c0_i32 = arith.constant 0 : i32
    return %arg2, %arg1 : i32, i32
  }
  func.func @transform_2(%arg0: i32, %arg1: i32, %arg2: i32) -> (i32, i32) {
    %c0_i32 = arith.constant 0 : i32
    return %arg0, %arg1 : i32, i32
  }
}

</mosaic_0001>

<bundles_post_ra>
// kernel: tpu_custom_call.1
= control target key start
LH: loop header
LB: loop body
LE: loop exit
PB: predicated region body
PF: predicated region fallthrough
CT: control target
= control target key end

     0   :  { %7 = vsyncpa [#allocation4], 0  ;;  %s291_s0 = inlined_call_operand.hbm [shape: f32[16,32], index: 0, kind: input, shape index: {}]   ;;  %s292_s1 = inlined_call_operand.hbm [shape: bf16[32,96], index: 1, kind: input, shape index: {}]   ;;  %s293_s2 = inlined_call_operand.hbm [shape: bf16[16,96], index: 2, kind: output, shape index: {}]  }
   0x1   :  { %8 = vsyncpa [#allocation7], 0 }
   0x2   :  { %9 = vsyncpa [#allocation5], 0  ;;  %s248_s9 = smov [#allocation3]  }
   0x3   :  { %s15_s10 = sshll.u32 %s248_s9, 4  ;;  %s16_s10 = int_to_ptr.vmem [resolvable:$true] %s15_s10 }
   0x4   :  { %s190_s11 = scalar_lea.vmem %s16_s10, 256  ;;  %p195_p1 = scmp.lt.s32.totalorder %s16_s10, %s16_s10 }
   0x5   :  { %p191_p0 = scmp.ne.s32.totalorder %s16_s10, %s190_s11  ;;  %p196_p2 = scmp.lt.s32.totalorder %s190_s11, %s190_s11 }
   0x7   :  { %p197_p3 = por %p196_p2, %p195_p1 }
   0x9   :  { %p198_p4 = pnand %p197_p3, %p191_p0 }
   0xb   :  { %201 = shalt.err (!%p198_p4)
}
   0xc   :  { %s249_s12 = smov 128   ;;  %s250_s13 = smov 8  }
   0xd   :  { %21 = dma.hbm_to_vmem [thread:$0]  %s291_s0, 256, %s16_s10, [#allocation4], %s249_s12, %s249_s12, %s250_s13  }
   0xe   :  { %s251_s16 = smov [#allocation6]  }
   0xf   :  { %s27_s17 = sshll.u32 %s251_s16, 4  ;;  %s28_s17 = int_to_ptr.vmem [resolvable:$true] %s27_s17 }
  0x10   :  { %s210_s18 = scalar_lea.vmem %s28_s17, 256  ;;  %p215_p6 = scmp.lt.s32.totalorder %s28_s17, %s28_s17 }
  0x11   :  { %p211_p5 = scmp.ne.s32.totalorder %s28_s17, %s210_s18  ;;  %p216_p7 = scmp.lt.s32.totalorder %s210_s18, %s210_s18 }
  0x13   :  { %p217_p8 = por %p216_p7, %p215_p6 }
  0x15   :  { %p218_p9 = pnand %p217_p8, %p211_p5 }
  0x17   :  { %221 = shalt.err (!%p218_p9)
}
  0x18   :  { %s252_s19 = smov 64   ;;  %s253_s20 = smov 4  }
  0x19   :  { %33 = dma.hbm_to_vmem [thread:$0]  %s292_s1, 256, %s28_s17, [#allocation7], %s252_s19, %s252_s19, %s253_s20  }
  0x1a   :  { %242 = dma.done.wait [#allocation4], 256  }
  0x1b   :  { %243 = vsyncadd [#allocation4], 4294967040 }
  0x1c   :  { %244 = dma.done.wait [#allocation7], 256  }
  0x1d   :  { %245 = vsyncadd [#allocation7], 4294967040  ;;  %vm45_vm0 = vcmask 785408   ;;  %v254_v0 = vmov 0.0   ;;  %vm255_vm1 = vmmov 0   ;;  %v180_v1 = vld [vmem:[#allocation6 + $0x8] sm:$0xff]  }
  0x1e   :  { %46 = vst.msk [vmem:[#allocation2] sm:$0xff] %vm45_vm0, %v254_v0  ;;  %47 = vst.msk [vmem:[#allocation2 + $0x8] sm:$0xff] %vm45_vm0, %v254_v0  ;;  %163 = vmatprep.subr.bf16.mxu0 %v254_v0  ;;  %167 = vmatprep.mubr.msk.bf16.mxu0 %vm255_vm1, %v254_v0  ;;  %v181_v2 = vld [vmem:[#allocation6] sm:$0xff]   ;;  %v48_v3 = vld [vmem:[#allocation3] sm:$0xff]  ;;  %vm69_vm2 = vcmask 261120   ;;  %vm132_vm3 = vcmask 781312  }
  0x1f   :  { %164 = vmatpush3.bf16.msra.mxu0 %v180_v1  ;;  %v49_v4 = vld [vmem:[#allocation3 + $0x8] sm:$0xff]  ;;  %s256_s0 = smov [#allocation8]  }
  0x20   :  { %165 = vmatprep.subr.bf16.mxu0 %v254_v0  ;;  %v50_v5 = vpack.c.bf16 %v49_v4, %v48_v3  ;;  %s140_s1 = sshll.u32 %s256_s0, 4  ;;  %s141_s1 = int_to_ptr.vmem [resolvable:$true] %s140_s1 }
  0x21   :  { %s222_s23 = scalar_lea.vmem %s141_s1, 128  ;;  %p227_p11 = scmp.lt.s32.totalorder %s141_s1, %s141_s1 }
  0x22   :  { %p223_p10 = scmp.ne.s32.totalorder %s141_s1, %s222_s23  ;;  %p228_p12 = scmp.lt.s32.totalorder %s222_s23, %s222_s23 }
  0x23   :  { %166 = vmatpush3.bf16.msra.mxu0 %v181_v2 }
  0x24   :  { %p229_p13 = por %p228_p12, %p227_p11 }
  0x25   :  { %v51_v6 = vld [vmem:[#allocation2] sm:$0xff]  ;;  %v52_v10 = vld [vmem:[#allocation2 + $0x8] sm:$0xff] }
  0x26   :  { %168 = vmatmul.mubr.msk.bf16.vlgmr.msra.gmra.mxu0 %vm69_vm2, %v50_v5  ;;  %p230_p0 = pnand %p229_p13, %p223_p10 }
  0xe6   :  { %v107_v7 = vpop.f32.mrf.mxu0 }
  0xe7   :  { %v114_v8 = vadd.f32 %v107_v7, %v51_v6 }
  0xe8   :  { %v169_v9 = vpop.f32.mrf.mxu0 }
  0xe9   :  { %117 = vst.msk [vmem:[#allocation2] sm:$0xff] %vm45_vm0, %v114_v8 }
  0xea   :  { %v110_v11 = vpop.f32.mrf.mxu0 }
  0xeb   :  { %v115_v12 = vadd.f32 %v110_v11, %v52_v10 }
  0xec   :  { %v170_v13 = vpop.f32.mrf.mxu0 }
  0xed   :  { %118 = vst.msk [vmem:[#allocation2 + $0x8] sm:$0xff] %vm45_vm0, %v115_v12 }
  0xf0   :  { %v122_v14 = vld [vmem:[#allocation2] sm:$0xff] }
  0xf1   :  { %v158_v15 = vpack.c.bf16 %v122_v14, %v122_v14 }
  0xf3   :  { %133 = vst.msk [vmem:[#allocation8] sm:$0xf] %vm132_vm3, %v158_v15 }
  0xf4   :  { %v123_v16 = vld [vmem:[#allocation2 + $0x8] sm:$0xff] }
  0xf5   :  { %v159_v17 = vpack.c.bf16 %v123_v16, %v123_v16 }
  0xf7   :  { %134 = vst.msk [vmem:[#allocation8 + $0x4] sm:$0xf] %vm132_vm3, %v159_v17 }
  0xf8   :  { %233 = shalt.err (!%p230_p0)
}
  0xf9   :  { %146 = dma.vmem_to_hbm [thread:$0]  %s141_s1, 128, %s293_s2, [#allocation5], %s252_s19, %s252_s19, %s253_s20  }
  0xfa   :  { %246 = dma.done.wait [#allocation5], 128  }
  0xfb   :  { %247 = vsyncadd [#allocation5], 4294967168 }
  0xfc   :  { %150 = vsyncpa [#allocation4], 1 }
  0xfd   :  { %151 = vsyncpa [#allocation7], 1 }
  0xfe   :  { %152 = vsyncpa [#allocation5], 1 }

</bundles_post_ra>
